<compile_context>
chip_gen: v7x
topology: tpu7x:2x2x1
jax: 0.10.0
libtpu: 0.0.40
codegen_flags: <defaults>
</compile_context>

<pallas_src>
import functools
import math

import jax
import jax.numpy as jnp
from jax.experimental import pallas as pl
from jax.experimental.pallas import tpu as pltpu


def _cdiv(a: int, b: int) -> int:
    return -(-a // b)


def _round_up(x: int, m: int) -> int:
    return _cdiv(x, m) * m


def _sublane_multiple(dtype) -> int:
    """Sublane packing requirement for block second-minor dims (8 f32 / 16 bf16 / 32 i8)."""
    itemsize = jnp.dtype(dtype).itemsize
    return max(8, 32 // max(itemsize, 1))


@functools.lru_cache(maxsize=1)
def _hw_params():
    """Return (total working-set byte target, physical VMEM bytes, #parallel TensorCores)."""
    kind = ""
    try:
        kind = (jax.devices()[0].device_kind or "").lower()
    except Exception:
        pass
    phys = None
    try:
        phys = int(pltpu.get_tpu_info().vmem_capacity_bytes)
    except Exception:
        phys = None

    is_v7 = ("v7" in kind) or ("tpu7" in kind) or ("7x" in kind)
    is_v6 = ("v6" in kind) or ("tpu6" in kind)
    if phys is None:
        phys = (64 if is_v7 else 128) * 1024 * 1024

    if is_v7:
        # 64 MiB physical VMEM per TC, 3.2 TB/s HBM, 2 TCs share the grid.
        per_buf, cores = 10 * 1024 * 1024, 2
    elif is_v6:
        # 128 MiB physical VMEM, 1.4 TB/s HBM: big tiles amortize per-step overhead.
        per_buf, cores = 12 * 1024 * 1024, 1
    else:
        # v5e / unknown: ~0.8 TB/s HBM — modest tiles already sit near roofline.
        per_buf, cores = 6 * 1024 * 1024, 1

    return 2 * per_buf, phys, cores


def _compiler_params(semantics, vmem_need_bytes, phys_vmem_bytes):
    limit = int(min(phys_vmem_bytes * 3 // 4,
                    max(32 * 1024 * 1024, vmem_need_bytes + (16 << 20))))
    return pltpu.CompilerParams(dimension_semantics=semantics,
                                vmem_limit_bytes=limit)


# ---------------------------------------------------------------------------
# Kernel 1: reduce over the trailing (lane) axis of a 2-D (M, N) array.
# ---------------------------------------------------------------------------
def _mean_last_single_kernel(x_ref, o_ref, *, inv_n):
    # Whole reduction fits one block: no scratch, no init/finalize.
    s = jnp.sum(x_ref[...], axis=-1, keepdims=True, dtype=jnp.float32)
    o_ref[...] = (s * inv_n).astype(o_ref.dtype)


def _mean_last_acc_kernel(x_ref, o_ref, acc_ref, *, inv_n, n, tn):
    nk = pl.program_id(1)
    last = pl.num_programs(1) - 1

    @pl.when(nk == 0)
    def _init():
        acc_ref[...] = jnp.zeros_like(acc_ref)

    def _accum(x):
        acc_ref[...] += jnp.sum(x, axis=-1, keepdims=True, dtype=jnp.float32)

    if n % tn == 0:  # static: no padded reduction block exists
        _accum(x_ref[...])
    else:            # static: only the last block needs lane masking
        @pl.when(nk < last)
        def _full():
            _accum(x_ref[...])

        @pl.when(nk == last)
        def _partial():
            x = x_ref[...]
            lane = nk * tn + jax.lax.broadcasted_iota(jnp.int32, x.shape, 1)
            _accum(jnp.where(lane < n, x, jnp.zeros_like(x)))

    @pl.when(nk == last)
    def _finish():
        o_ref[...] = (acc_ref[...] * inv_n).astype(o_ref.dtype)


def _mean_last_axis(x2d: jax.Array) -> jax.Array:
    """Mean over the last axis of a 2-D array. Returns (M, 1)."""
    M, N = x2d.shape
    dt = x2d.dtype
    isz = jnp.dtype(dt).itemsize
    sub = _sublane_multiple(dt)
    ws, phys, cores = _hw_params()

    tm_min = M if M <= sub else sub
    n_pad_full = _round_up(N, 128)

    # Reduction (lane) tile: keep full N unless that would force a tiny row tile.
    row_cost_full = 2 * n_pad_full * isz + 2 * 128 * isz
    if N <= 128 or min(M, 512) * row_cost_full <= ws:
        tn, multi_n = N, False
    else:
        target_rows = max(tm_min, min(M, 512))
        avail = max(2 * 128 * isz, ws // target_rows - (2 * 128 * isz + 128 * 4))
        tn = max(128, (avail // (2 * isz)) // 128 * 128)
        if tn >= N:
            tn, multi_n = N, False
        else:
            multi_n = True

    # Row tile sized purely by the padded-VMEM byte budget:
    #   2x input block + 2x lane-padded (tm,1) output block + f32 scratch (if any).
    row_cost = (2 * _round_up(tn, 128) * isz
                + 2 * 128 * isz
                + (128 * 4 if multi_n else 0))
    tm = min(M, max(tm_min, ws // row_cost))
    if tm < M:
        tm = max(sub, (tm // sub) * sub)

    # v7x: both TensorCores need parallel grid iterations.
    if cores > 1 and _cdiv(M, tm) < cores and M > sub:
        tm = max(sub, (_cdiv(M, cores) // sub) * sub)

    vmem_need = tm * row_cost
    out_shape = jax.ShapeDtypeStruct((M, 1), dt)

    if not multi_n:
        grid = (_cdiv(M, tm),)
        return pl.pallas_call(
            functools.partial(_mean_last_single_kernel, inv_n=1.0 / float(N)),
            out_shape=out_shape,
            grid_spec=pltpu.PrefetchScalarGridSpec(
                num_scalar_prefetch=0,
                grid=grid,
                in_specs=[pl.BlockSpec((tm, N), lambda i: (i, 0))],
                out_specs=pl.BlockSpec((tm, 1), lambda i: (i, 0)),
            ),
            compiler_params=_compiler_params(("parallel",), vmem_need, phys),
        )(x2d)

    grid = (_cdiv(M, tm), _cdiv(N, tn))
    return pl.pallas_call(
        functools.partial(_mean_last_acc_kernel, inv_n=1.0 / float(N), n=N, tn=tn),
        out_shape=out_shape,
        grid_spec=pltpu.PrefetchScalarGridSpec(
            num_scalar_prefetch=0,
            grid=grid,
            in_specs=[pl.BlockSpec((tm, tn), lambda i, k: (i, k))],
            out_specs=pl.BlockSpec((tm, 1), lambda i, k: (i, 0)),
            scratch_shapes=[pltpu.VMEM((tm, 1), jnp.float32)],
        ),
        compiler_params=_compiler_params(("parallel", "arbitrary"), vmem_need, phys),
    )(x2d)


# ---------------------------------------------------------------------------
# Kernel 2: reduce over the middle (sublane) axis of a 3-D (PRE, R, POST) array;
# POST stays on lanes, so the (PRE, POST) output is lane-dense (no transpose).
# ---------------------------------------------------------------------------
def _mean_mid_single_kernel(x_ref, o_ref, *, inv_r):
    s = jnp.sum(x_ref[...], axis=1, dtype=jnp.float32)
    o_ref[...] = (s * inv_r).astype(o_ref.dtype)


def _mean_mid_acc_kernel(x_ref, o_ref, acc_ref, *, inv_r, r, tr):
    rk = pl.program_id(2)
    last = pl.num_programs(2) - 1

    @pl.when(rk == 0)
    def _init():
        acc_ref[...] = jnp.zeros_like(acc_ref)

    def _accum(x):
        acc_ref[...] += jnp.sum(x, axis=1, dtype=jnp.float32)

    if r % tr == 0:  # static: no padded reduction block exists
        _accum(x_ref[...])
    else:            # static: only the last block needs masking along R
        @pl.when(rk < last)
        def _full():
            _accum(x_ref[...])

        @pl.when(rk == last)
        def _partial():
            x = x_ref[...]
            ridx = rk * tr + jax.lax.broadcasted_iota(jnp.int32, x.shape, 1)
            _accum(jnp.where(ridx < r, x, jnp.zeros_like(x)))

    @pl.when(rk == last)
    def _finish():
        o_ref[...] = (acc_ref[...] * inv_r).astype(o_ref.dtype)


def _mean_middle_axis(x3d: jax.Array) -> jax.Array:
    """Mean over the middle axis of a 3-D array. Returns (PRE, POST)."""
    PRE, R, POST = x3d.shape
    dt = x3d.dtype
    isz = jnp.dtype(dt).itemsize
    sub = _sublane_multiple(dt)
    ws, phys, cores = _hw_params()

    tpre_min = PRE if PRE <= sub else sub

    # Kept trailing (lane) axis: full POST unless the byte budget forces tiling.
    tpost = POST
    col_cost_min = tpre_min * (2 * sub * isz + 2 * isz + 4)  # per padded lane column
    if POST > 128 and _round_up(POST, 128) * col_cost_min > ws:
        tpost = max(128, min(POST, (ws // col_cost_min) // 128 * 128))
    ppad = _round_up(tpost, 128)

    # Reduction (sublane) axis: full R (single tile, no scratch) if it fits the
    # budget at the minimal tpre; otherwise tile R (partial last block is masked).
    r_rnd = _round_up(R, sub)
    per_pre_full = 2 * r_rnd * ppad * isz + 2 * ppad * isz
    if tpre_min * per_pre_full <= ws:
        tr, multi_r = R, False
    else:
        avail = max(2 * ppad * isz, ws // tpre_min - ppad * (2 * isz + 4))
        tr = max(sub, (avail // (2 * ppad * isz)) // sub * sub)
        if tr >= R:
            tr, multi_r = R, False
        else:
            multi_r = True

    # Leading kept axis fills out the remaining budget.
    per_pre = (2 * _round_up(tr, sub) * ppad * isz
               + 2 * ppad * isz
               + (ppad * 4 if multi_r else 0))
    tpre = min(PRE, max(tpre_min, ws // per_pre))
    if tpre < PRE:
        tpre = max(sub, (tpre // sub) * sub)

    # v7x: both TensorCores need parallel grid iterations.
    if cores > 1 and _cdiv(PRE, tpre) * _cdiv(POST, tpost) < cores:
        if PRE > sub:
            tpre = max(sub, (_cdiv(PRE, cores) // sub) * sub)
        elif POST > 128 and tpost == POST:
            tpost = max(128, (_cdiv(POST, cores) // 128) * 128)

    vmem_need = tpre * per_pre
    out_shape = jax.ShapeDtypeStruct((PRE, POST), dt)

    if not multi_r:
        grid = (_cdiv(PRE, tpre), _cdiv(POST, tpost))
        return pl.pallas_call(
            functools.partial(_mean_mid_single_kernel, inv_r=1.0 / float(R)),
            out_shape=out_shape,
            grid_spec=pltpu.PrefetchScalarGridSpec(
                num_scalar_prefetch=0,
                grid=grid,
                in_specs=[pl.BlockSpec((tpre, R, tpost), lambda p, q: (p, 0, q))],
                out_specs=pl.BlockSpec((tpre, tpost), lambda p, q: (p, q)),
            ),
            compiler_params=_compiler_params(("parallel", "parallel"), vmem_need, phys),
        )(x3d)

    grid = (_cdiv(PRE, tpre), _cdiv(POST, tpost), _cdiv(R, tr))
    return pl.pallas_call(
        functools.partial(_mean_mid_acc_kernel, inv_r=1.0 / float(R), r=R, tr=tr),
        out_shape=out_shape,
        grid_spec=pltpu.PrefetchScalarGridSpec(
            num_scalar_prefetch=0,
            grid=grid,
            in_specs=[pl.BlockSpec((tpre, tr, tpost), lambda p, q, k: (p, k, q))],
            out_specs=pl.BlockSpec((tpre, tpost), lambda p, q, k: (p, q)),
            scratch_shapes=[pltpu.VMEM((tpre, tpost), jnp.float32)],
        ),
        compiler_params=_compiler_params(("parallel", "parallel", "arbitrary"),
                                         vmem_need, phys),
    )(x3d)


# ---------------------------------------------------------------------------
# Module wrapper (matches torch AveragePooling forward semantics).
# ---------------------------------------------------------------------------
class AveragePooling:
    """JAX/Pallas port of page.model.layer.AveragePooling: tensor.mean(dim, keepdim)."""

    def __init__(self, dim: int = -1, keepdim: bool = False):
        self.dim = dim
        self.keepdim = keepdim

    def __call__(self, tensor: jax.Array) -> jax.Array:
        ndim = tensor.ndim
        dim = self.dim + ndim if self.dim < 0 else self.dim
        shape = tensor.shape
        pre = math.prod(shape[:dim])
        r = shape[dim]
        post = math.prod(shape[dim + 1:])

        if post == 1:
            # Reducing the trailing (lane) axis: 2-D row-tiled lane reduction.
            out = _mean_last_axis(tensor.reshape(pre, r))
        else:
            # Reduction axis is not trailing: keep the memory layout (no
            # transpose), reduce over sublanes, lane-dense output.
            out = _mean_middle_axis(tensor.reshape(pre, r, post))

        out = out.reshape(shape[:dim] + shape[dim + 1:])
        if self.keepdim:
            out = jnp.expand_dims(out, dim)
        return out


if __name__ == "__main__":
    key = jax.random.PRNGKey(0)
    k1, k2, k3 = jax.random.split(key, 3)

    # Small sequence-style input: (batch=2, seq=8, hidden=32)
    x = jax.random.normal(k1, (2, 8, 32), dtype=jnp.float32)

    # default: mean over the last (hidden) dim
    pool = AveragePooling(dim=-1, keepdim=False)
    y = jax.block_until_ready(pool(x))
    y_ref = jnp.mean(x, axis=-1)
    assert y.shape == y_ref.shape, (y.shape, y_ref.shape)
    assert jnp.allclose(y, y_ref, atol=1e-5, rtol=1e-5)

    # mean over the sequence dim with keepdim (sublane-reduce, lane-dense out)
    pool2 = AveragePooling(dim=1, keepdim=True)
    y2 = jax.block_until_ready(pool2(x))
    y2_ref = jnp.mean(x, axis=1, keepdims=True)
    assert y2.shape == y2_ref.shape, (y2.shape, y2_ref.shape)
    assert jnp.allclose(y2, y2_ref, atol=1e-5, rtol=1e-5)

    # mean over the batch dim
    pool3 = AveragePooling(dim=0, keepdim=False)
    y3 = jax.block_until_ready(pool3(x))
    y3_ref = jnp.mean(x, axis=0)
    assert y3.shape == y3_ref.shape, (y3.shape, y3_ref.shape)
    assert jnp.allclose(y3, y3_ref, atol=1e-5, rtol=1e-5)

    # Wide rows: exercises the tiled + masked lane-reduction (accumulator) path.
    xb = jax.random.normal(k2, (600, 8192), dtype=jnp.float32)
    yb = jax.block_until_ready(AveragePooling(dim=-1)(xb))
    yb_ref = jnp.mean(xb, axis=-1)
    assert yb.shape == yb_ref.shape
    assert jnp.allclose(yb, yb_ref, atol=1e-5, rtol=1e-4)

    # Long middle axis: exercises the tiled + masked sublane-reduction path.
    xc = jax.random.normal(k3, (8, 4096, 128), dtype=jnp.float32)
    yc = jax.block_until_ready(AveragePooling(dim=1, keepdim=False)(xc))
    yc_ref = jnp.mean(xc, axis=1)
    assert yc.shape == yc_ref.shape
    assert jnp.allclose(yc, yc_ref, atol=1e-5, rtol=1e-4)

    # bfloat16 input (sublane-packing / widening-sum path).
    xd = jax.random.normal(k1, (128, 256), dtype=jnp.bfloat16)
    yd = jax.block_until_ready(AveragePooling(dim=-1)(xd))
    yd_ref = jnp.mean(xd.astype(jnp.float32), axis=-1).astype(jnp.bfloat16)
    assert yd.shape == yd_ref.shape
    assert jnp.allclose(yd.astype(jnp.float32), yd_ref.astype(jnp.float32),
                        atol=2e-2, rtol=2e-2)

    print("KERNEL_OK")
</pallas_src>

<mosaic_0001>
module attributes {stable_mosaic.version = 11 : i64} {
  func.func @_mean_last_single_kernel(%arg0: i32, %arg1: memref<16x32xf32, #tpu.memory_space<vmem>>, %arg2: memref<16x1xf32, #tpu.memory_space<vmem>>) attributes {dimension_semantics = [#tpu.dimension_semantics<parallel>], iteration_bounds = array<i64: 1>, scalar_prefetch = 0 : i64, scratch_operands = 0 : i64, tpu.core_type = #tpu.core_type<tc>, window_params = [{transform_indices = @transform_0, window_bounds = array<i64: 16, 32>}, {transform_indices = @transform_1, window_bounds = array<i64: 16, 1>}]} {
    %c0 = arith.constant 0 : index
    %c0_0 = arith.constant 0 : index
    %0 = vector.load %arg1[%c0, %c0_0] : memref<16x32xf32, #tpu.memory_space<vmem>>, vector<16x32xf32>
    %cst = arith.constant dense<0.000000e+00> : vector<16xf32>
    %1 = vector.multi_reduction <add>, %0, %cst [1] : vector<16x32xf32> to vector<16xf32>
    %2 = vector.shape_cast %1 : vector<16xf32> to vector<16x1xf32>
    %cst_1 = arith.constant 3.125000e-02 : f32
    %3 = vector.broadcast %cst_1 : f32 to vector<16x1xf32>
    %4 = arith.mulf %2, %3 : vector<16x1xf32>
    %c0_2 = arith.constant 0 : index
    %c0_3 = arith.constant 0 : index
    %5 = vector.load %arg2[%c0_2, %c0_3] : memref<16x1xf32, #tpu.memory_space<vmem>>, vector<16x1xf32>
    tpu.vector_store %arg2[%c0_2, %c0_3], %4 {strides = array<i32>} : memref<16x1xf32, #tpu.memory_space<vmem>>, vector<16x1xf32>,
    return
  }
  func.func @transform_0(%arg0: i32) -> (i32, i32) {
    %c0_i32 = arith.constant 0 : i32
    %c0_i32_0 = arith.constant 0 : i32
    return %arg0, %c0_i32 : i32, i32
  }
  func.func @transform_1(%arg0: i32) -> (i32, i32) {
    %c0_i32 = arith.constant 0 : i32
    %c0_i32_0 = arith.constant 0 : i32
    return %arg0, %c0_i32 : i32, i32
  }
}

</mosaic_0001>

<bundles_post_ra>
// kernel: tpu_custom_call.1
= control target key start
LH: loop header
LB: loop body
LE: loop exit
PB: predicated region body
PF: predicated region fallthrough
CT: control target
= control target key end

     0   :  { %6 = vsyncpa [#allocation3], 0  ;;  %s68_s6 = smov [#allocation2]   ;;  %s99_s0 = inlined_call_operand.hbm [shape: f32[16,32], index: 0, kind: input, shape index: {}]   ;;  %s100_s1 = inlined_call_operand.vmem [shape: f32[16,1], index: 1, kind: output, shape index: {}]  }
   0x1   :  { %s12_s7 = sshll.u32 %s68_s6, 4  ;;  %s44_s10 = scalar_lea.hbm %s99_s0, 256  ;;  %s13_s7 = int_to_ptr.vmem [resolvable:$true] %s12_s7 }
   0x2   :  { %p45_p0 = scmp.ne.s32.totalorder %s99_s0, %s44_s10  ;;  %p48_p1 = scmp.lt.u32.totalorder %s44_s10, %s99_s0 }
   0x4   :  { %p50_p2 = pnand %p48_p1, %p45_p0 }
   0x6   :  { %53 = shalt.err (!%p50_p2)
}
   0x7   :  { %s54_s15 = scalar_lea.vmem %s13_s7, 256  ;;  %p59_p4 = scmp.lt.s32.totalorder %s13_s7, %s13_s7 }
   0x8   :  { %p55_p3 = scmp.ne.s32.totalorder %s13_s7, %s54_s15  ;;  %p60_p5 = scmp.lt.s32.totalorder %s54_s15, %s54_s15 }
   0xa   :  { %p61_p6 = por %p60_p5, %p59_p4 }
   0xc   :  { %p62_p7 = pnand %p61_p6, %p55_p3 }
   0xe   :  { %65 = shalt.err (!%p62_p7)
}
   0xf   :  { %s69_s16 = smov 128   ;;  %s70_s17 = smov 8  }
  0x10   :  { %18 = dma.hbm_to_vmem [thread:$0]  %s99_s0, 256, %s13_s7, [#allocation3], %s69_s16, %s69_s16, %s70_s17  }
  0x11   :  { %66 = dma.done.wait [#allocation3], 256  }
  0x12   :  { %67 = vsyncadd [#allocation3], 4294967040  ;;  %vm24_vm0 = vcmask 261120   ;;  %v22_v0 = vld [vmem:[#allocation2] sm:$0xff]  ;;  %v23_v1 = vld [vmem:[#allocation2 + $0x8] sm:$0xff]  ;;  %vm33_vm1 = vcmask 7168  }
  0x13   :  { %v25_v2 = vsel %vm24_vm0, %v22_v0, 0.0  ;;  %v28_v3 = vsel %vm24_vm0, %v23_v1, 0.0 }
  0x14   :  { %26 = vadd.xlane.f32.xlu0 %v25_v2 }
  0x18   :  { %29 = vadd.xlane.f32.xlu0 %v28_v3 }
  0xa1   :  { %v27_v4 = vpop.xlane.xlu0 %26 }
  0xa2   :  { %v31_v5 = vmul.f32 0.03125, %v27_v4 }
  0xa4   :  { %34 = vst.msk [vmem:[%s100_s1] sm:$0xff] %vm33_vm1, %v31_v5 }
  0xa5   :  { %v30_v6 = vpop.xlane.xlu0 %29 }
  0xa6   :  { %v32_v7 = vmul.f32 0.03125, %v30_v6 }
  0xa8   :  { %35 = vst.msk [vmem:[%s100_s1 + $0x8] sm:$0xff] %vm33_vm1, %v32_v7 }
  0xa9   :  { %40 = vsyncpa [#allocation3], 1 }

</bundles_post_ra>
